<compile_context>
chip_gen: v5e
topology: v5e:2x2
jax: 0.10.0
libtpu: 0.0.40
codegen_flags: <defaults>
</compile_context>

<pallas_src>
import functools
import math

import jax
import jax.numpy as jnp
from jax.experimental import pallas as pl
from jax.experimental.pallas import tpu as pltpu


# --------------------------------------------------------------------------- setup

def _build_pe_rows(d_model: int, n_rows: int) -> jnp.ndarray:
    """First n_rows of the PyTorch sinusoidal PE buffer, shape (n_rows, d_model), f32."""
    assert d_model % 2 == 0, "sinusoidal PE (PyTorch recipe) requires even d_model"
    position = jnp.arange(0, n_rows, dtype=jnp.float32)[:, None]
    div_term = jnp.exp(
        jnp.arange(0, d_model, 2, dtype=jnp.float32) * (-math.log(10000.0) / d_model))
    angles = position * div_term
    pe = jnp.zeros((n_rows, d_model), dtype=jnp.float32)
    pe = pe.at[:, 0::2].set(jnp.sin(angles))
    pe = pe.at[:, 1::2].set(jnp.cos(angles))
    return pe


def _choose_seq_tile(S: int, x_row_bytes: int, pe_row_bytes: int,
                     target_bytes: int = 4 << 20,
                     budget_bytes: int = 40 << 20) -> int:
    """~4 MiB x-tiles, rows a multiple of 8, >=4 grid steps when S allows, VMEM-budgeted."""
    if S <= 8:
        return S
    # Bandwidth target: ~4 MiB per x tile amortises the ~0.35 us per-grid-step overhead.
    rows = max(8, ((target_bytes // max(x_row_bytes, 1)) // 8) * 8)
    # Megacore balance (v7x): keep at least 4 grid steps (2 for short sequences).
    if S >= 32:
        rows = min(rows, max(8, ((S // 4) // 8) * 8))
    else:
        rows = min(rows, 8)
    # Explicit VMEM budget: double-buffered x-in + out + pe tiles per grid step.
    per_row = 2 * (2 * x_row_bytes + pe_row_bytes)
    rows = min(rows, max(8, ((budget_bytes // max(per_row, 1)) // 8) * 8))
    return min(rows, S)


# --------------------------------------------------------------------------- kernel

def _pe_add_kernel(x_ref, pe_ref, o_ref, *, batch):
    # x_ref / o_ref: (seq_tile, B*D) lane-dense tiles; pe_ref: (seq_tile, D) streamed tile.
    pe = pe_ref[...].astype(o_ref.dtype)            # cast once per (seq_tile, D)
    if batch > 1:
        # Replicate across the B batch copies along the lane axis (cheap vs B x trig).
        pe = jnp.concatenate([pe] * batch, axis=1)  # (seq_tile, B*D)
    o_ref[...] = x_ref[...] + pe


# --------------------------------------------------------------------------- wrapper

def positional_encoding_forward(x: jnp.ndarray, *, max_len: int = 5000,
                                pe_table: jnp.ndarray | None = None,
                                seq_tile: int | None = None) -> jnp.ndarray:
    """x: (S, B, D) seq-first.  Returns x + sinusoidal PE broadcast over batch."""
    S, B, D = x.shape
    if pe_table is not None:
        max_len = pe_table.shape[0]
    if S > max_len:
        raise ValueError(f"sequence length {S} exceeds max_len {max_len}")

    pe_rows = (pe_table[:S] if pe_table is not None
               else _build_pe_rows(D, S)).astype(jnp.float32)

    bd = B * D
    itemsize = jnp.dtype(x.dtype).itemsize
    x_row_bytes = bd * itemsize
    pe_row_bytes = D * 4
    if seq_tile is None:
        seq_tile = _choose_seq_tile(S, x_row_bytes, pe_row_bytes)
    grid = (pl.cdiv(S, seq_tile),)

    # Double-buffered footprint: 2x x-in tile + 2x out tile + 2x pe tile (+ headroom).
    footprint = seq_tile * (2 * 2 * x_row_bytes + 2 * pe_row_bytes)
    vmem_limit = int(min(max(2 * footprint + (4 << 20), 16 << 20), 60 << 20))

    x2 = x.reshape(S, bd)                            # contiguous -> lane-dense rows
    out2 = pl.pallas_call(
        functools.partial(_pe_add_kernel, batch=B),
        out_shape=jax.ShapeDtypeStruct((S, bd), x.dtype),
        grid_spec=pltpu.PrefetchScalarGridSpec(
            num_scalar_prefetch=0,
            grid=grid,
            in_specs=[
                pl.BlockSpec((seq_tile, bd), lambda s: (s, 0)),   # x tile (lane-dense)
                pl.BlockSpec((seq_tile, D), lambda s: (s, 0)),    # pe rows for this tile
            ],
            out_specs=pl.BlockSpec((seq_tile, bd), lambda s: (s, 0)),
        ),
        compiler_params=pltpu.CompilerParams(
            dimension_semantics=(pltpu.PARALLEL,),
            vmem_limit_bytes=vmem_limit,
        ),
        cost_estimate=pl.CostEstimate(
            flops=S * bd,
            transcendentals=0,
            bytes_accessed=2 * S * bd * itemsize + S * D * 4,
        ),
        # Note: pass input_output_aliases={0: 0} when the caller donates x (in-place add).
    )(x2, pe_rows)
    return out2.reshape(S, B, D)


# --------------------------------------------------------------------------- demo

if __name__ == "__main__":
    key = jax.random.PRNGKey(0)
    k1, k2 = jax.random.split(key)

    # Small shapes consistent with the module's forward: (seq, batch, d_model).
    S, B, D = 8, 2, 32
    x = jax.random.normal(k1, (S, B, D), dtype=jnp.float32)

    out = positional_encoding_forward(x)
    out = jax.block_until_ready(out)

    ref = x + _build_pe_rows(D, S)[:, None, :]
    assert out.shape == (S, B, D)
    assert jnp.allclose(out, ref, atol=1e-5), "mismatch vs reference (small case)"

    # Larger check: multi-step cdiv grid with a partial last block (44 rows, tile 8).
    S2, B2, D2 = 44, 4, 128
    x2 = jax.random.normal(k2, (S2, B2, D2), dtype=jnp.float32)
    out2 = jax.block_until_ready(positional_encoding_forward(x2))
    ref2 = x2 + _build_pe_rows(D2, S2)[:, None, :]
    assert jnp.allclose(out2, ref2, atol=1e-5), "mismatch vs reference (tiled case)"

    # TODO(synk): dropout commonly applied after the PE add in full transformer stacks is
    # not part of this module's forward and is intentionally omitted.
    print("KERNEL_OK")
</pallas_src>

<mosaic_0001>
module attributes {stable_mosaic.version = 11 : i64} {
  func.func @_pe_add_kernel(%arg0: i32, %arg1: memref<8x64xf32, #tpu.memory_space<vmem>>, %arg2: memref<8x32xf32, #tpu.memory_space<vmem>>, %arg3: memref<8x64xf32, #tpu.memory_space<vmem>>) attributes {dimension_semantics = [#tpu.dimension_semantics<parallel>], iteration_bounds = array<i64: 1>, scalar_prefetch = 0 : i64, scratch_operands = 0 : i64, tpu.core_type = #tpu.core_type<tc>, window_params = [{transform_indices = @transform_0, window_bounds = array<i64: 8, 64>}, {transform_indices = @transform_1, window_bounds = array<i64: 8, 32>}, {transform_indices = @transform_2, window_bounds = array<i64: 8, 64>}]} {
    %c0 = arith.constant 0 : index
    %c0_0 = arith.constant 0 : index
    %0 = vector.load %arg2[%c0, %c0_0] : memref<8x32xf32, #tpu.memory_space<vmem>>, vector<8x32xf32>
    %1 = tpu.concatenate %0, %0 in 1 : vector<8x32xf32>, vector<8x32xf32> -> vector<8x64xf32>
    %c0_1 = arith.constant 0 : index
    %c0_2 = arith.constant 0 : index
    %2 = vector.load %arg1[%c0_1, %c0_2] : memref<8x64xf32, #tpu.memory_space<vmem>>, vector<8x64xf32>
    %3 = arith.addf %2, %1 : vector<8x64xf32>
    %c0_3 = arith.constant 0 : index
    %c0_4 = arith.constant 0 : index
    %4 = vector.load %arg3[%c0_3, %c0_4] : memref<8x64xf32, #tpu.memory_space<vmem>>, vector<8x64xf32>
    tpu.vector_store %arg3[%c0_3, %c0_4], %3 {strides = array<i32>} : memref<8x64xf32, #tpu.memory_space<vmem>>, vector<8x64xf32>,
    return
  }
  func.func @transform_0(%arg0: i32) -> (i32, i32) {
    %c0_i32 = arith.constant 0 : i32
    %c0_i32_0 = arith.constant 0 : i32
    return %arg0, %c0_i32 : i32, i32
  }
  func.func @transform_1(%arg0: i32) -> (i32, i32) {
    %c0_i32 = arith.constant 0 : i32
    %c0_i32_0 = arith.constant 0 : i32
    return %arg0, %c0_i32 : i32, i32
  }
  func.func @transform_2(%arg0: i32) -> (i32, i32) {
    %c0_i32 = arith.constant 0 : i32
    %c0_i32_0 = arith.constant 0 : i32
    return %arg0, %c0_i32 : i32, i32
  }
}

</mosaic_0001>

<bundles_post_ra>
// kernel: tpu_custom_call.1
= control target key start
LH: loop header
LB: loop body
LE: loop exit
PB: predicated region body
PF: predicated region fallthrough
CT: control target
= control target key end

     0   :  { %7 = vsyncpa [#allocation3], 0  ;;  %s179_s0 = inlined_call_operand.hbm [shape: f32[8,64], index: 0, kind: input, shape index: {}]   ;;  %s180_s1 = inlined_call_operand.hbm [shape: f32[8,32], index: 1, kind: input, shape index: {}]   ;;  %s181_s2 = inlined_call_operand.hbm [shape: f32[8,64], index: 2, kind: output, shape index: {}]  }
   0x1   :  { %8 = vsyncpa [#allocation6], 0 }
   0x2   :  { %9 = vsyncpa [#allocation4], 0  ;;  %s15_s11 = sshll.u32 %s179_s0, 4  ;;  %s151_s12 = smov [#allocation2]   ;;  %s16_s11 = int_to_ptr.hbm [resolvable:$true] %s15_s11 }
   0x3   :  { %s17_s13 = sshll.u32 %s151_s12, 4  ;;  %s26_s16 = sshll.u32 %s180_s1, 4  ;;  %s18_s13 = int_to_ptr.vmem [resolvable:$true] %s17_s13  ;;  %s27_s16 = int_to_ptr.hbm [resolvable:$true] %s26_s16 }
   0x4   :  { %20 = dma.hbm_to_vmem [thread:$0]  %s16_s11, 128, %s18_s13, [#allocation3]  }
   0x5   :  { %s152_s17 = smov [#allocation5]  }
   0x6   :  { %s28_s18 = sshll.u32 %s152_s17, 4  ;;  %s29_s18 = int_to_ptr.vmem [resolvable:$true] %s28_s18 }
   0x7   :  { %31 = dma.hbm_to_vmem [thread:$0]  %s27_s16, 128, %s29_s18, [#allocation6]  }
   0x8   :  { %145 = dma.done.wait [#allocation3], 128  }
   0x9   :  { %146 = vsyncadd [#allocation3], 4294967168 }
   0xa   :  { %147 = dma.done.wait [#allocation6], 128  }
   0xb   :  { %148 = vsyncadd [#allocation6], 4294967168  ;;  %v40_v0 = vld [vmem:[#allocation5] sm:$0xff]  ;;  %s153_s0 = smov 32   ;;  %vm45_vm0 = vcmask 261120   ;;  %v47_v1 = vld [vmem:[#allocation2] sm:$0xff] }
   0xc   :  { %42 = vrot.lane.b32.xlu0 %v40_v0, %s153_s0  ;;  %s154_s19 = smov [#allocation7]   ;;  %s58_s1 = sshll.u32 %s181_s2, 4  ;;  %vm49_vm1 = vcmask 523264   ;;  %s59_s1 = int_to_ptr.hbm [resolvable:$true] %s58_s1 }
   0xd   :  { %s56_s20 = sshll.u32 %s154_s19, 4  ;;  %s57_s20 = int_to_ptr.vmem [resolvable:$true] %s56_s20 }
  0x7e   :  { %v43_v2 = vpop.permute.xlu0 %42 }
  0x7f   :  { %v46_v3 = vsel %vm45_vm0, %v40_v0, %v43_v2 }
  0x80   :  { %v48_v4 = vadd.f32 %v47_v1, %v46_v3 }
  0x82   :  { %50 = vst.msk [vmem:[#allocation7] sm:$0xff] %vm49_vm1, %v48_v4 }
  0x83   :  { %61 = dma.vmem_to_hbm [thread:$0]  %s57_s20, 128, %s59_s1, [#allocation4]  }
  0x84   :  { %149 = dma.done.wait [#allocation4], 128  }
  0x85   :  { %150 = vsyncadd [#allocation4], 4294967168 }
  0x86   :  { %66 = vsyncpa [#allocation3], 1 }
  0x87   :  { %67 = vsyncpa [#allocation6], 1 }
  0x88   :  { %68 = vsyncpa [#allocation4], 1 }

</bundles_post_ra>
